<compile_context>
chip_gen: v7x
topology: tpu7x:2x2x1
jax: 0.10.0
libtpu: 0.0.40
codegen_flags: <defaults>
</compile_context>

<pallas_src>
import functools

import jax
import jax.numpy as jnp
from jax.experimental import pallas as pl
from jax.experimental.pallas import tpu as pltpu


def _round_up(x, m):
    return (x + m - 1) // m * m


def gat_layer_kernel(x_ref, xt_ref, adj_ref, w_ref, a1_ref, a2_ref, o_ref,
                     *, heads, out_p, tq, slope):
    """One MultiHeadGAT layer for a TQ-row query tile.

    x_ref   (N, D_P)        bf16  node features (keys/values), resident across grid
    xt_ref  (D_P, N)        bf16  transposed features (for the key-side f2 matmul)
    adj_ref (TQ, N)         int8  adjacency row tile (0/1)
    w_ref   (D_P, H*OUT_P)  bf16  per-head W^T in 128-aligned column blocks
    a1_ref  (D_P, 128)      bf16  column hd = W_hd^T a1_hd   (query-side score)
    a2_ref  (8, D_P)        bf16  row hd    = W_hd^T a2_hd   (key-side score)
    o_ref   (TQ, OUT_P)     f32/bf16  tanh(mean_h att_h @ Wh_h), lane-dense
    """
    i = pl.program_id(0)
    q0 = pl.multiple_of(i * tq, tq)

    x_keys = x_ref[...]                          # (N, D_P)   all keys (resident)
    x_q = x_ref[pl.ds(q0, tq), :]                # (TQ, D_P)  this tile's query rows

    # Key-side projections (bf16 MXU, f32 accumulation). Recomputed per row
    # tile -- negligible at these sizes.
    # TODO(synk): at production N hoist Wh/f2 into a separate projection pass
    # (or a flash-style KV-tile axis) instead of recomputing per query tile.
    wh_all = jnp.dot(x_keys, w_ref[...], preferred_element_type=jnp.float32)       # (N, H*OUT_P)
    f2_all = jnp.dot(a2_ref[...], xt_ref[...], preferred_element_type=jnp.float32)  # (8, N)
    f1_q = jnp.dot(x_q, a1_ref[...], preferred_element_type=jnp.float32)            # (TQ, 128)

    # Additive mask built in-kernel from the int8 adjacency tile (one select per
    # tile, reused by every head). NOTE: rows with no neighbors/self-loop give a
    # degenerate softmax, exactly like the PyTorch module.
    adj_f = adj_ref[...].astype(jnp.float32)                                         # (TQ, N)
    bias = jnp.where(adj_f > 0.0, jnp.float32(0.0), jnp.float32(-9e15))

    acc = jnp.zeros((tq, out_p), jnp.float32)
    for hd in range(heads):                              # static unroll, heads is small
        wh = wh_all[:, hd * out_p:(hd + 1) * out_p]      # (N, OUT_P) 128-aligned view
        f1 = f1_q[:, hd:hd + 1]                          # (TQ, 1)
        f2 = f2_all[hd:hd + 1, :]                        # (1, N)
        e = f1 + f2                                      # (TQ, N) raw logits
        e = jnp.maximum(e, slope * e)                    # LeakyReLU (needs 0<=slope<=1)
        logits = e + bias                                # masked logits
        m = jnp.max(logits, axis=1, keepdims=True)
        p = jnp.exp(logits - m)                          # f32 (v5e EUP has no bf16)
        s = jnp.sum(p, axis=1, keepdims=True)
        att = p / s                                      # exact softmax normalization
        acc = acc + jnp.dot(att.astype(jnp.bfloat16), wh.astype(jnp.bfloat16),
                            preferred_element_type=jnp.float32)
    o_ref[...] = jnp.tanh(acc * (1.0 / heads)).astype(o_ref.dtype)


def _prepare_layer(W, a, out_p):
    """Fold a1/a2 through W and lay weights out 128-lane aligned, pre-transposed.

    W: (H, out, inp) per-head nn.Linear weights; a: (H, 2, out), a[:,0]=a1, a[:,1]=a2.
    Returns bf16 (w_aug (D_P, H*OUT_P), a1wT (D_P, 128), a2w (8, D_P)).
    """
    H, out, inp = W.shape
    d_p = _round_up(inp, 128)
    w_aug = jnp.zeros((d_p, H * out_p), jnp.float32)
    a1wt = jnp.zeros((d_p, 128), jnp.float32)
    a2w = jnp.zeros((8, d_p), jnp.float32)
    for hd in range(H):
        wt = W[hd].T                                              # (inp, out)
        w_aug = w_aug.at[:inp, hd * out_p:hd * out_p + out].set(wt)
        a1wt = a1wt.at[:inp, hd].set(wt @ a[hd, 0])
        a2w = a2w.at[hd, :inp].set(wt @ a[hd, 1])
    return (w_aug.astype(jnp.bfloat16), a1wt.astype(jnp.bfloat16),
            a2w.astype(jnp.bfloat16))


def _gat_layer(x, adj_i8, w_aug, a1wt, a2w, *, heads, out_p, slope, row_tile,
               out_dtype):
    n, d_p = x.shape
    tq = row_tile
    assert n % tq == 0, "TODO(synk): pad N to a multiple of the row tile"
    xt = x.T  # wrapper-side layout plumbing (keeps both projections NN-form)
    kernel = functools.partial(gat_layer_kernel, heads=heads, out_p=out_p,
                               tq=tq, slope=slope)
    return pl.pallas_call(
        kernel,
        out_shape=jax.ShapeDtypeStruct((n, out_p), out_dtype),
        grid=(n // tq,),
        in_specs=[
            pl.BlockSpec((n, d_p), lambda i: (0, 0)),            # x (keys): resident
            pl.BlockSpec((d_p, n), lambda i: (0, 0)),            # x^T: resident
            pl.BlockSpec((tq, n), lambda i: (i, 0)),             # int8 adj row tile
            pl.BlockSpec((d_p, heads * out_p), lambda i: (0, 0)),  # W (pre-transposed)
            pl.BlockSpec((d_p, 128), lambda i: (0, 0)),          # a1 folded through W
            pl.BlockSpec((8, d_p), lambda i: (0, 0)),            # a2 folded through W
        ],
        out_specs=pl.BlockSpec((tq, out_p), lambda i: (i, 0)),
        compiler_params=pltpu.CompilerParams(
            dimension_semantics=("parallel",),
            vmem_limit_bytes=32 * 1024 * 1024,
        ),
    )(x, xt, adj_i8, w_aug, a1wt, a2w)


def _pick_row_tile(n):
    # TODO(synk): per-generation tuning -- ~halve on v7x (64 MiB VMEM, 2 TCs),
    # raise toward 256-512 on v6e/v5e (128 MiB VMEM) once the adj tile dominates.
    for t in (256, 128, 64, 32):
        if n % t == 0:
            return t
    return n


def gat_forward(h, adj, params, slope=0.01, row_tile=None):
    """GAT.forward: two MultiHeadGAT layers sharing adj (one pallas_call each)."""
    assert 0.0 <= slope <= 1.0, "LeakyReLU-as-max trick requires 0 <= slope <= 1"
    H, out, inp = params["W1"].shape
    assert H <= 8
    n = h.shape[0]
    out_p = _round_up(out, 128)
    if row_tile is None:
        row_tile = _pick_row_tile(n)

    # int8 adjacency (4x less DMA/VMEM than an f32 additive bias).
    adj_i8 = (adj > 0).astype(jnp.int8)

    # Layer 1: inp -> out. Features zero-padded to 128 lanes, bf16 for the MXU.
    d1_p = _round_up(inp, 128)
    x1 = jnp.zeros((n, d1_p), jnp.float32).at[:, :inp].set(h).astype(jnp.bfloat16)
    w1, a1w1, a2w1 = _prepare_layer(params["W1"], params["a1"], out_p)
    y1 = _gat_layer(x1, adj_i8, w1, a1w1, a2w1, heads=H, out_p=out_p, slope=slope,
                    row_tile=row_tile, out_dtype=jnp.bfloat16)

    # Layer 2: out -> out. y1 is already (n, out_p) bf16 with zero lane padding,
    # so it feeds straight in; padded weight rows are zero.
    w2, a1w2, a2w2 = _prepare_layer(params["W2"], params["a2"], out_p)
    y2 = _gat_layer(y1, adj_i8, w2, a1w2, a2w2, heads=H, out_p=out_p, slope=slope,
                    row_tile=row_tile, out_dtype=jnp.float32)
    return y2[:, :out]


# ----------------------- pure-JAX reference for validation -----------------------
def multihead_gat_ref(h, adj, W, a, slope):
    outs = []
    for hd in range(W.shape[0]):
        Wh = h @ W[hd].T
        f1 = Wh @ a[hd, 0]
        f2 = Wh @ a[hd, 1]
        e = f1[:, None] + f2[None, :]
        e = jnp.where(e > 0, e, slope * e)
        att = jnp.where(adj > 0, e, jnp.float32(-9e15))
        att = jax.nn.softmax(att, axis=1)
        outs.append(att @ Wh)
    return jnp.tanh(jnp.mean(jnp.stack(outs, axis=0), axis=0))


def gat_forward_ref(h, adj, params, slope=0.01):
    out = multihead_gat_ref(h, adj, params["W1"], params["a1"], slope)
    out = multihead_gat_ref(out, adj, params["W2"], params["a2"], slope)
    return out


# ----------------------------------- main -----------------------------------
def init_params(key, inp, out, heads):
    """Deterministic init mimicking nn.Linear uniform(-1/sqrt(fan_in), 1/sqrt(fan_in))."""
    k = jax.random.split(key, 4)

    def uni(kk, shape, fan_in):
        b = 1.0 / jnp.sqrt(jnp.float32(fan_in))
        return jax.random.uniform(kk, shape, jnp.float32, -b, b)

    return {
        # layer 1: inp -> out
        "W1": uni(k[0], (heads, out, inp), inp),
        "a1": uni(k[1], (heads, 2, out), 2 * out),   # rows (a1 | a2) of nn.Linear(2*out, 1)
        # layer 2: out -> out
        "W2": uni(k[2], (heads, out, out), out),
        "a2": uni(k[3], (heads, 2, out), 2 * out),
    }


if __name__ == "__main__":
    key = jax.random.PRNGKey(0)
    kh, kadj, kp = jax.random.split(key, 3)

    N, INP, OUT, HEADS, SLOPE = 64, 16, 32, 2, 0.01

    h = jax.random.normal(kh, (N, INP), jnp.float32)
    adj = (jax.random.uniform(kadj, (N, N)) > 0.5).astype(jnp.float32)
    adj = jnp.maximum(adj, jnp.eye(N, dtype=jnp.float32))  # self-loops

    params = init_params(kp, INP, OUT, HEADS)

    # row_tile=32 -> 2 grid steps (exercises the row-tiled index maps) and keeps
    # the int8 adjacency block at its native 32-row sublane packing.
    out = jax.block_until_ready(gat_forward(h, adj, params, SLOPE, row_tile=32))
    ref = jax.block_until_ready(gat_forward_ref(h, adj, params, SLOPE))

    assert out.shape == (N, OUT)
    err = jnp.max(jnp.abs(out - ref))
    # bf16 MXU operands (per perf review) across two stacked attention layers
    # drift vs the pure-f32 reference; elementwise/softmax math stays f32.
    assert jnp.allclose(out, ref, rtol=3e-2, atol=3e-2), f"max abs diff {err}"
    print("KERNEL_OK")
</pallas_src>

<mosaic_0001>
module attributes {stable_mosaic.version = 11 : i64} {
  func.func @gat_layer_kernel(%arg0: i32, %arg1: memref<64x128xbf16, #tpu.memory_space<vmem>>, %arg2: memref<128x64xbf16, #tpu.memory_space<vmem>>, %arg3: memref<32x64xi8, #tpu.memory_space<vmem>>, %arg4: memref<128x256xbf16, #tpu.memory_space<vmem>>, %arg5: memref<128x128xbf16, #tpu.memory_space<vmem>>, %arg6: memref<8x128xbf16, #tpu.memory_space<vmem>>, %arg7: memref<32x128xbf16, #tpu.memory_space<vmem>>) attributes {dimension_semantics = [#tpu.dimension_semantics<parallel>], iteration_bounds = array<i64: 2>, scalar_prefetch = 0 : i64, scratch_operands = 0 : i64, tpu.core_type = #tpu.core_type<tc>, window_params = [{pipeline_mode = #tpu.pipeline_mode<synchronous>, transform_indices = @transform_0, window_bounds = array<i64: 64, 128>}, {pipeline_mode = #tpu.pipeline_mode<synchronous>, transform_indices = @transform_1, window_bounds = array<i64: 128, 64>}, {transform_indices = @transform_2, window_bounds = array<i64: 32, 64>}, {pipeline_mode = #tpu.pipeline_mode<synchronous>, transform_indices = @transform_3, window_bounds = array<i64: 128, 256>}, {pipeline_mode = #tpu.pipeline_mode<synchronous>, transform_indices = @transform_4, window_bounds = array<i64: 128, 128>}, {pipeline_mode = #tpu.pipeline_mode<synchronous>, transform_indices = @transform_5, window_bounds = array<i64: 8, 128>}, {transform_indices = @transform_6, window_bounds = array<i64: 32, 128>}]} {
    %c32_i32 = arith.constant 32 : i32
    %0 = arith.muli %arg0, %c32_i32 : i32
    %1 = tpu.assume_multiple %0, 32 : i32
    %c0 = arith.constant 0 : index
    %c0_0 = arith.constant 0 : index
    %2 = vector.load %arg1[%c0, %c0_0] : memref<64x128xbf16, #tpu.memory_space<vmem>>, vector<64x128xbf16>
    %3 = arith.index_cast %1 : i32 to index
    %c0_1 = arith.constant 0 : index
    %4 = vector.load %arg1[%3, %c0_1] : memref<64x128xbf16, #tpu.memory_space<vmem>>, vector<32x128xbf16>
    %c0_2 = arith.constant 0 : index
    %c0_3 = arith.constant 0 : index
    %5 = vector.load %arg4[%c0_2, %c0_3] : memref<128x256xbf16, #tpu.memory_space<vmem>>, vector<128x256xbf16>
    %cst = arith.constant dense<0.000000e+00> : vector<64x256xf32>
    %6 = tpu.matmul %2, %5, %cst {dimension_numbers = #tpu.dot_dimension_numbers<[1], [0], [0], [1], [0, 0, 1, 1], [], []>} : vector<64x128xbf16>, vector<128x256xbf16>, vector<64x256xf32> -> vector<64x256xf32>
    %c0_4 = arith.constant 0 : index
    %c0_5 = arith.constant 0 : index
    %7 = vector.load %arg6[%c0_4, %c0_5] : memref<8x128xbf16, #tpu.memory_space<vmem>>, vector<8x128xbf16>
    %c0_6 = arith.constant 0 : index
    %c0_7 = arith.constant 0 : index
    %8 = vector.load %arg2[%c0_6, %c0_7] : memref<128x64xbf16, #tpu.memory_space<vmem>>, vector<128x64xbf16>
    %cst_8 = arith.constant dense<0.000000e+00> : vector<8x64xf32>
    %9 = tpu.matmul %7, %8, %cst_8 {dimension_numbers = #tpu.dot_dimension_numbers<[1], [0], [0], [1], [0, 0, 1, 1], [], []>} : vector<8x128xbf16>, vector<128x64xbf16>, vector<8x64xf32> -> vector<8x64xf32>
    %c0_9 = arith.constant 0 : index
    %c0_10 = arith.constant 0 : index
    %10 = vector.load %arg5[%c0_9, %c0_10] : memref<128x128xbf16, #tpu.memory_space<vmem>>, vector<128x128xbf16>
    %cst_11 = arith.constant dense<0.000000e+00> : vector<32x128xf32>
    %11 = tpu.matmul %4, %10, %cst_11 {dimension_numbers = #tpu.dot_dimension_numbers<[1], [0], [0], [1], [0, 0, 1, 1], [], []>} : vector<32x128xbf16>, vector<128x128xbf16>, vector<32x128xf32> -> vector<32x128xf32>
    %c0_12 = arith.constant 0 : index
    %c0_13 = arith.constant 0 : index
    %12 = vector.load %arg3[%c0_12, %c0_13] : memref<32x64xi8, #tpu.memory_space<vmem>>, vector<32x64xi8>
    %13 = arith.sitofp %12 : vector<32x64xi8> to vector<32x64xf32>
    %cst_14 = arith.constant 0.000000e+00 : f32
    %14 = vector.broadcast %cst_14 : f32 to vector<32x64xf32>
    %15 = arith.cmpf ogt, %13, %14 : vector<32x64xf32>
    %cst_15 = arith.constant 0.000000e+00 : f32
    %cst_16 = arith.constant -9.000000e+15 : f32
    %16 = vector.broadcast %cst_15 : f32 to vector<32x64xf32>
    %17 = vector.broadcast %cst_16 : f32 to vector<32x64xf32>
    %18 = arith.select %15, %16, %17 : vector<32x64xi1>, vector<32x64xf32>
    %cst_17 = arith.constant 0.000000e+00 : f32
    %19 = vector.broadcast %cst_17 : f32 to vector<32x128xf32>
    %20 = vector.extract_strided_slice %6 {offsets = [0, 0], sizes = [64, 128], strides = [1, 1]} : vector<64x256xf32> to vector<64x128xf32>
    %21 = vector.extract_strided_slice %11 {offsets = [0, 0], sizes = [32, 1], strides = [1, 1]} : vector<32x128xf32> to vector<32x1xf32>
    %22 = vector.extract_strided_slice %9 {offsets = [0, 0], sizes = [1, 64], strides = [1, 1]} : vector<8x64xf32> to vector<1x64xf32>
    %23 = vector.broadcast %21 : vector<32x1xf32> to vector<32x64xf32>
    %24 = vector.broadcast %22 : vector<1x64xf32> to vector<32x64xf32>
    %25 = arith.addf %23, %24 : vector<32x64xf32>
    %cst_18 = arith.constant 0.00999999977 : f32
    %26 = vector.broadcast %cst_18 : f32 to vector<32x64xf32>
    %27 = arith.mulf %26, %25 : vector<32x64xf32>
    %28 = arith.maximumf %25, %27 : vector<32x64xf32>
    %29 = arith.addf %28, %18 : vector<32x64xf32>
    %cst_19 = arith.constant dense<0xFF800000> : vector<32xf32>
    %30 = vector.multi_reduction <maximumf>, %29, %cst_19 [1] : vector<32x64xf32> to vector<32xf32>
    %31 = vector.shape_cast %30 : vector<32xf32> to vector<32x1xf32>
    %32 = vector.broadcast %31 : vector<32x1xf32> to vector<32x64xf32>
    %33 = arith.subf %29, %32 : vector<32x64xf32>
    %34 = math.exp %33 : vector<32x64xf32>
    %cst_20 = arith.constant dense<0.000000e+00> : vector<32xf32>
    %35 = vector.multi_reduction <add>, %34, %cst_20 [1] : vector<32x64xf32> to vector<32xf32>
    %36 = vector.shape_cast %35 : vector<32xf32> to vector<32x1xf32>
    %37 = vector.broadcast %36 : vector<32x1xf32> to vector<32x64xf32>
    %38 = arith.divf %34, %37 : vector<32x64xf32>
    %39 = arith.truncf %38 : vector<32x64xf32> to vector<32x64xbf16>
    %40 = arith.truncf %20 : vector<64x128xf32> to vector<64x128xbf16>
    %cst_21 = arith.constant dense<0.000000e+00> : vector<32x128xf32>
    %41 = tpu.matmul %39, %40, %cst_21 {dimension_numbers = #tpu.dot_dimension_numbers<[1], [0], [0], [1], [0, 0, 1, 1], [], []>} : vector<32x64xbf16>, vector<64x128xbf16>, vector<32x128xf32> -> vector<32x128xf32>
    %42 = arith.addf %19, %41 : vector<32x128xf32>
    %43 = vector.extract_strided_slice %6 {offsets = [0, 128], sizes = [64, 128], strides = [1, 1]} : vector<64x256xf32> to vector<64x128xf32>
    %44 = vector.extract_strided_slice %11 {offsets = [0, 1], sizes = [32, 1], strides = [1, 1]} : vector<32x128xf32> to vector<32x1xf32>
    %45 = vector.extract_strided_slice %9 {offsets = [1, 0], sizes = [1, 64], strides = [1, 1]} : vector<8x64xf32> to vector<1x64xf32>
    %46 = vector.broadcast %44 : vector<32x1xf32> to vector<32x64xf32>
    %47 = vector.broadcast %45 : vector<1x64xf32> to vector<32x64xf32>
    %48 = arith.addf %46, %47 : vector<32x64xf32>
    %cst_22 = arith.constant 0.00999999977 : f32
    %49 = vector.broadcast %cst_22 : f32 to vector<32x64xf32>
    %50 = arith.mulf %49, %48 : vector<32x64xf32>
    %51 = arith.maximumf %48, %50 : vector<32x64xf32>
    %52 = arith.addf %51, %18 : vector<32x64xf32>
    %cst_23 = arith.constant dense<0xFF800000> : vector<32xf32>
    %53 = vector.multi_reduction <maximumf>, %52, %cst_23 [1] : vector<32x64xf32> to vector<32xf32>
    %54 = vector.shape_cast %53 : vector<32xf32> to vector<32x1xf32>
    %55 = vector.broadcast %54 : vector<32x1xf32> to vector<32x64xf32>
    %56 = arith.subf %52, %55 : vector<32x64xf32>
    %57 = math.exp %56 : vector<32x64xf32>
    %cst_24 = arith.constant dense<0.000000e+00> : vector<32xf32>
    %58 = vector.multi_reduction <add>, %57, %cst_24 [1] : vector<32x64xf32> to vector<32xf32>
    %59 = vector.shape_cast %58 : vector<32xf32> to vector<32x1xf32>
    %60 = vector.broadcast %59 : vector<32x1xf32> to vector<32x64xf32>
    %61 = arith.divf %57, %60 : vector<32x64xf32>
    %62 = arith.truncf %61 : vector<32x64xf32> to vector<32x64xbf16>
    %63 = arith.truncf %43 : vector<64x128xf32> to vector<64x128xbf16>
    %cst_25 = arith.constant dense<0.000000e+00> : vector<32x128xf32>
    %64 = tpu.matmul %62, %63, %cst_25 {dimension_numbers = #tpu.dot_dimension_numbers<[1], [0], [0], [1], [0, 0, 1, 1], [], []>} : vector<32x64xbf16>, vector<64x128xbf16>, vector<32x128xf32> -> vector<32x128xf32>
    %65 = arith.addf %42, %64 : vector<32x128xf32>
    %cst_26 = arith.constant 5.000000e-01 : f32
    %66 = vector.broadcast %cst_26 : f32 to vector<32x128xf32>
    %67 = arith.mulf %65, %66 : vector<32x128xf32>
    %68 = math.tanh %67 : vector<32x128xf32>
    %69 = arith.truncf %68 : vector<32x128xf32> to vector<32x128xbf16>
    %c0_27 = arith.constant 0 : index
    %c0_28 = arith.constant 0 : index
    %70 = vector.load %arg7[%c0_27, %c0_28] : memref<32x128xbf16, #tpu.memory_space<vmem>>, vector<32x128xbf16>
    tpu.vector_store %arg7[%c0_27, %c0_28], %69 {strides = array<i32>} : memref<32x128xbf16, #tpu.memory_space<vmem>>, vector<32x128xbf16>,
    return
  }
  func.func @transform_0(%arg0: i32) -> (i32, i32) {
    %c0_i32 = arith.constant 0 : i32
    %c0_i32_0 = arith.constant 0 : i32
    %c0_i32_1 = arith.constant 0 : i32
    return %c0_i32, %c0_i32_0 : i32, i32
  }
  func.func @transform_1(%arg0: i32) -> (i32, i32) {
    %c0_i32 = arith.constant 0 : i32
    %c0_i32_0 = arith.constant 0 : i32
    %c0_i32_1 = arith.constant 0 : i32
    return %c0_i32, %c0_i32_0 : i32, i32
  }
  func.func @transform_2(%arg0: i32) -> (i32, i32) {
    %c0_i32 = arith.constant 0 : i32
    %c0_i32_0 = arith.constant 0 : i32
    return %arg0, %c0_i32 : i32, i32
  }
  func.func @transform_3(%arg0: i32) -> (i32, i32) {
    %c0_i32 = arith.constant 0 : i32
    %c0_i32_0 = arith.constant 0 : i32
    %c0_i32_1 = arith.constant 0 : i32
    return %c0_i32, %c0_i32_0 : i32, i32
  }
  func.func @transform_4(%arg0: i32) -> (i32, i32) {
    %c0_i32 = arith.constant 0 : i32
    %c0_i32_0 = arith.constant 0 : i32
    %c0_i32_1 = arith.constant 0 : i32
    return %c0_i32, %c0_i32_0 : i32, i32
  }
  func.func @transform_5(%arg0: i32) -> (i32, i32) {
    %c0_i32 = arith.constant 0 : i32
    %c0_i32_0 = arith.constant 0 : i32
    %c0_i32_1 = arith.constant 0 : i32
    return %c0_i32, %c0_i32_0 : i32, i32
  }
  func.func @transform_6(%arg0: i32) -> (i32, i32) {
    %c0_i32 = arith.constant 0 : i32
    %c0_i32_0 = arith.constant 0 : i32
    return %arg0, %c0_i32 : i32, i32
  }
}

</mosaic_0001>

<bundles_post_ra>
// kernel: tpu_custom_call.1
= control target key start
LH: loop header
LB: loop body
LE: loop exit
PB: predicated region body
PF: predicated region fallthrough
CT: control target
= control target key end

     0   :  { %11 = vsyncpa [#allocation3], 0  ;;  %s1991_s0 = inlined_call_operand.vmem [shape: bf16[64,128], index: 0, kind: input, shape index: {}]   ;;  %s1992_s1 = inlined_call_operand.vmem [shape: bf16[128,64], index: 1, kind: input, shape index: {}]   ;;  %s1993_s2 = inlined_call_operand.hbm [shape: s8[64,64], index: 2, kind: input, shape index: {}]   ;;  %s1994_s3 = inlined_call_operand.hbm [shape: bf16[128,256], index: 3, kind: input, shape index: {}]   ;;  %s1995_s4 = inlined_call_operand.vmem [shape: bf16[128,128], index: 4, kind: input, shape index: {}]   ;;  %s1996_s5 = inlined_call_operand.vmem [shape: bf16[8,128], index: 5, kind: input, shape index: {}]   ;;  %s1997_s6 = inlined_call_operand.hbm [shape: bf16[64,128], index: 6, kind: output, shape index: {}]  }
   0x1   :  { %13 = vsyncpa [#allocation3 + $0x1], 0 }
   0x2   :  { %14 = vsyncpa [#allocation6], 0 }
   0x3   :  { %15 = vsyncpa [#allocation4], 0 }
   0x4   :  { %17 = vsyncpa [#allocation4 + $0x1], 0  ;;  %s1667_s21 = smov 0   ;;  %s1669_s22 = smov 0  }
   0x5   :  { %s1671_s23 = smov 0   ;;  %s1673_s24 = smov 0  }
   0x6 LB: > { %s1688_s25 = sadd.s32 4294967295, %s1618_s24   ;;  %s1155_s26 = sadd.s32 4294967294, %s1618_s24   ;;  %s1618_s24 = sphi %s1673_s24, %s2017_s24   ;;  %s1614_s23 = sphi %s1671_s23, %s2016_s23   ;;  %s1610_s22 = sphi %s1669_s22, %s2015_s22   ;;  %s1606_s21 = sphi %s1667_s21, %s2014_s21  }
   0x7   : > { %p85_p0 = scmp.ne.s32.totalorder %s1610_s22, %s1606_s21  ;;  %p1998_p1 = scmp.eq.s32.totalorder %s1688_s25, 0 }
   0x8   : > { %p178_p3 = scmp.eq.s32.totalorder %s1155_s26, 1  ;;  %p1156_p5 = scmp.ge.s32.totalorder %s1618_s24, 1 }
   0x9   : > { %p1697_p4 = por %p1998_p1, %p85_p0  ;;  %p185_p7 = scmp.lt.s32.totalorder %s1618_s24, 3 }
   0xa   : > { %p1702_p6 = por %p178_p3, %p85_p0  ;;  %s1620_s30 = smov [#allocation5]  }
   0xb   : > { %s2001_s27 = scalar_select %p1697_p4, 1, 0 }
   0xc   : > { %s2002_s28 = scalar_select %p1702_p6, 1, 0 }
   0xd   : > { %p1707_p8 = pnand %p1156_p5, %p185_p7  ;;  %s203_s7 = sshll.u32 %s1620_s30, 4  ;;  %s1711_s7 = int_to_ptr.vmem [resolvable:$true] %s203_s7 }
   0xe   : > { %s1723_s9 = sadd.s32 1, %s1618_s24   ;;  %s72_s10 = sadd.s32 1, %s1614_s23 }
   0xf   : > { %s2003_s29 = scalar_select %p1707_p8, 1, 0 }
  0x10   : > { %p1341_p9 = pneg %p1707_p8  ;;  %s69_s11 = ssub.s32 %s1618_s24, %s1723_s9 }
  0x11   : > { %s1490_s14 = scalar_lea.hbm %s1994_s3, 2048 }
  0x12   : > { %p1718_p11 = pnand %p1341_p9, %p1998_p1  ;;  %p1491_p12 = scmp.ne.s32.totalorder %s1994_s3, %s1490_s14 }
  0x13   : > { %p1497_p5 = scmp.lt.u32.totalorder %s1490_s14, %s1994_s3 }
  0x14   : > { %p1492_p13 = pneg %p1718_p11 }
  0x16   : > { %p1493_p0 = pnand %p1492_p13, %p1491_p12 }
  0x18   : > { %p1494_p3 = pneg %p1493_p0 }
  0x1a   : > { %p1499_p7 = pnand %p1497_p5, %p1494_p3 }
  0x1c   : > { %1502 = shalt.err (!%p1499_p7)
}
  0x1d   : > { %s1503_s19 = scalar_lea.vmem %s1711_s7, 2048  ;;  %p1511_p2 = scmp.lt.s32.totalorder %s1711_s7, %s1711_s7 }
  0x1e   : > { %p1504_p9 = scmp.ne.s32.totalorder %s1711_s7, %s1503_s19  ;;  %p1512_p6 = scmp.lt.s32.totalorder %s1503_s19, %s1503_s19 }
  0x20   : > { %p1506_p10 = pnand %p1504_p9, %p1492_p13  ;;  %p1513_p4 = por %p1512_p6, %p1511_p2 }
  0x22   : > { %p1507_p1 = pneg %p1506_p10 }
  0x24   : > { %p1514_p8 = pnand %p1513_p4, %p1507_p1 }
  0x26   : > { %1517 = shalt.err (!%p1514_p8)
}
  0x27   : > { %s1621_s20 = smov 128   ;;  %s1622_s26 = smov 8  }
  0x28   : > { %1344 = dma.hbm_to_vmem [thread:$0]  (!%p1718_p11), %s1994_s3, 2048, %s1711_s7, [#allocation6], %s1621_s20, %s1621_s20, %s1622_s26  }
  0x29   : > { %p70_p2 = scmp.eq.s32.totalorder %s69_s11, 0  ;;  %p79_p1 = scmp.ne.s32.totalorder %s1614_s23, %s1610_s22 }
  0x2a   : > { %p80_p4 = scmp.eq.s32.totalorder %s1618_s24, 0  ;;  %p1354_p6 = scmp.lt.s32.totalorder %s1618_s24, 2 }
  0x2b   : > { %s1754_s13 = scalar_select %p70_p2, %s1614_s23, %s72_s10  }
  0x2c   : > { %p81_p8 = por %p80_p4, %p79_p1  ;;  %p2005_p10 = scmp.eq.s32.totalorder %s1688_s25, 1 }
  0x2d   : > { %s223_s15 = sand.u32 1, %s1614_s23   ;;  %s1160_s16 = sshll.u32 %s1618_s24, 7 }
  0x2e   : > { %p1758_p12 = por %p2005_p10, %p79_p1  ;;  %s1159_s17 = sshll.u32 %s223_s15, 3 }
  0x2f   : > { %s1767_s19 = scalar_lea.hbm %s1993_s2, %s1160_s16  ;;  %s227_s7 = scalar_lea.vmem [#allocation2], %s1159_s17 }
  0x30   : > { %s234_s10 = sshll.u32 %s227_s7, 4  ;;  %p1769_p11 = pnand %p1354_p6, %p81_p8  ;;  %s1773_s10 = int_to_ptr.vmem [resolvable:$true] %s234_s10 }
  0x31   : > { %s224_s20 = scalar_lea.sflag [#allocation3], %s223_s15  ;;  %s1518_s26 = scalar_lea.hbm %s1767_s19, 128 }
  0x32   : > { %p1519_p13 = scmp.ne.s32.totalorder %s1767_s19, %s1518_s26  ;;  %p1520_p0 = pneg %p1769_p11 }
  0x33   : > { %s1523_s16 = scalar_lea.hbm %s1993_s2, 256  ;;  %p1524_p7 = scmp.lt.u32.totalorder %s1767_s19, %s1993_s2 }
  0x34   : > { %p1521_p3 = pnand %p1520_p0, %p1519_p13  ;;  %p1525_p9 = scmp.lt.u32.totalorder %s1523_s16, %s1518_s26 }
  0x35   : > { %p1527_p1 = scmp.lt.u32.totalorder %s1518_s26, %s1767_s19 }
  0x36   : > { %p1522_p5 = pneg %p1521_p3  ;;  %p1526_p2 = por %p1525_p9, %p1524_p7 }
  0x38   : > { %p1528_p4 = por %p1527_p1, %p1526_p2 }
  0x3a   : > { %p1529_p6 = pnand %p1528_p4, %p1522_p5 }
  0x3c   : > { %1532 = shalt.err (!%p1529_p6)
}
  0x3d   : > { %s1533_s15 = scalar_lea.vmem %s1773_s10, 128  ;;  %s1623_s18 = smov [#allocation2]  }
  0x3e   : > { %p1534_p8 = scmp.ne.s32.totalorder %s1773_s10, %s1533_s15  ;;  %s1538_s7 = sshll.u32 %s1623_s18, 4  ;;  %s1539_s7 = int_to_ptr.vmem [resolvable:$false] %s1538_s7 }
  0x3f   : > { %s1540_s30 = scalar_lea.vmem %s1539_s7, 256  ;;  %p1541_p3 = scmp.lt.s32.totalorder %s1773_s10, %s1539_s7 }
  0x40   : > { %p1536_p10 = pnand %p1534_p8, %p1520_p0  ;;  %p1542_p7 = scmp.lt.s32.totalorder %s1540_s30, %s1533_s15 }
  0x42   : > { %p1537_p13 = pneg %p1536_p10  ;;  %p1543_p9 = por %p1542_p7, %p1541_p3 }
  0x44   : > { %p1544_p2 = pnand %p1543_p9, %p1537_p13 }
  0x46   : > { %1547 = shalt.err (!%p1544_p2)
}
  0x47   : > { %1348 = dma.hbm_to_vmem [thread:$0]  (!%p1769_p11), %s1767_s19, 128, %s1773_s10, %s224_s20  }
  0x48   : > { %p2008_p5 = scmp.ne.s32.totalorder %s2003_s29, 0 }
  0x49   : > { %s1803_s26 = sand.u32 (!%p2008_p5), 1, %s1610_s22   ;;  %p2009_p0 = scmp.ne.s32.totalorder (!%p2008_p5), %s2001_s27, 0 }
  0x4a   : > { %243 = sbr.rel (%p2008_p5) target bundleno = 1086 (0x43e), region = 44  ;;  %s1162_s12 = sshll.u32 (!%p2008_p5), %s1803_s26, 3 }
  0x4b   : > { %s246_s16 = scalar_lea.sflag (!%p2008_p5), [#allocation3], %s1803_s26  ;;  %s1807_s17 = scalar_lea.vmem (!%p2008_p5), [#allocation2], %s1162_s12 }
  0x51   : > { %1593 = dma.done.wait (%p2009_p0), %s246_s16, 128  }
  0x52   : > { %1595 = vsyncadd (%p2009_p0), %s246_s16, 4294967168  ;;  %p2010_p11 = scmp.eq.s32.totalorder %s1688_s25, 0 }
  0x54   : > { %1597 = dma.done.wait (%p2010_p11), [#allocation6], 2048   ;;  %p2011_p1 = pmov %p2010_p11 }
  0x55   : > { %v1624_v0 = vmov 0   ;;  %v1625_v1 = vmov 0.0   ;;  %vm1626_vm0 = vmmov 0   ;;  %v1404_v2 = vld [vmem:[#allocation5 + $0x4] ss:$8 sps:$4 sm:$0xff]   ;;  %s1165_s27 = sshll.u32 %s1688_s25, 5 }
  0x56   : > { %1599 = vsyncadd (%p2011_p1), [#allocation6], 4294965248  ;;  %453 = vmatprep.mubr.bf16.mxu0 %v1624_v0  ;;  %1265 = vmatprep.subr.bf16.mxu1 %v1625_v1  ;;  %v1406_v3 = vld [vmem:[#allocation5] ss:$8 sps:$4 sm:$0xff]   ;;  %v1407_v4 = vld [vmem:[#allocation5 + $0x14] ss:$8 sps:$4 sm:$0xff]  }
  0x57   : > { %1281 = vmatprep.mubr.msk.bf16.mxu1 %vm1626_vm0, %v1625_v1  ;;  %421 = vmatprep.subr.bf16.mxu0 %v1404_v2  ;;  %v1409_v5 = vld [vmem:[#allocation5 + $0x10] ss:$8 sps:$4 sm:$0xff]   ;;  %v1410_v6 = vld [vmem:[#allocation5 + $0x24] ss:$8 sps:$4 sm:$0xff]   ;;  %v1412_v7 = vld [vmem:[#allocation5 + $0x20] ss:$8 sps:$4 sm:$0xff]  }
  0x58   : > { %422 = vmatpush1.bf16.msra.mxu0 %v1406_v3  ;;  %v1413_v8 = vld [vmem:[#allocation5 + $0x34] ss:$8 sps:$4 sm:$0xff]   ;;  %v1415_v9 = vld [vmem:[#allocation5 + $0x30] ss:$8 sps:$4 sm:$0xff]   ;;  %v1416_v10 = vld [vmem:[#allocation5 + $0x44] ss:$8 sps:$4 sm:$0xff]  }
  0x59   : > { %423 = vmatprep.subr.bf16.mxu0 %v1407_v4  ;;  %s293_s29 = sshra.s32 %s1165_s27, 3  ;;  %v1418_v11 = vld [vmem:[#allocation5 + $0x40] ss:$8 sps:$4 sm:$0xff]   ;;  %v1419_v12 = vld [vmem:[#allocation5 + $0x54] ss:$8 sps:$4 sm:$0xff]   ;;  %v1627_v41 = vmov 1  }
  0x5a   : > { %s1166_s19 = sshll.u32 %s293_s29, 2  ;;  %v1421_v13 = vld [vmem:[#allocation5 + $0x50] ss:$8 sps:$4 sm:$0xff]   ;;  %v1422_v14 = vld [vmem:[#allocation5 + $0x64] ss:$8 sps:$4 sm:$0xff]   ;;  %1400 = vset.pattern.permute.xlu1 %v1627_v41  ;;  %1399 = vset.pattern.permute.xlu0 %v1627_v41  ;;  %vm781_vm4 = vcmask 523264  }
  0x5b   : > { %s1824_s20 = scalar_lea.vmem %s1991_s0, %s1166_s19  ;;  %v1424_v15 = vld [vmem:[#allocation5 + $0x60] ss:$8 sps:$4 sm:$0xff]   ;;  %v1425_v16 = vld [vmem:[#allocation5 + $0x74] ss:$8 sps:$4 sm:$0xff]   ;;  %v1427_v18 = vld [vmem:[#allocation5 + $0x70] ss:$8 sps:$4 sm:$0xff]  }
  0x5c   : > { %424 = vmatpush1.bf16.msra.mxu0 %v1409_v5  ;;  %v1442_v17 = vld [vmem:[%s1992_s1] sm:$0xff]   ;;  %v1443_v19 = vld [vmem:[%s1992_s1 + $0x8] sm:$0xff]   ;;  %v1444_v23 = vld [vmem:[%s1992_s1 + $0x10] sm:$0xff]   ;;  %s1629_s8 = smov [#allocation7]  }
  0x5d   : > { %425 = vmatprep.subr.bf16.mxu0 %v1410_v6  ;;  %1266 = vmatpush3.bf16.msra.mxu1 %v1442_v17  ;;  %v1429_v20 = vld [vmem:[%s1995_s4] sm:$0xff]   ;;  %v1430_v22 = vld [vmem:[%s1995_s4 + $0x8] sm:$0xff]   ;;  %v1432_v24 = vld [vmem:[%s1995_s4 + $0x10] sm:$0xff]   ;;  %s1552_s15 = sshll.u32 %s1629_s8, 4  ;;  %s1553_s15 = int_to_ptr.vmem [resolvable:$false] %s1552_s15 }
  0x5e   : > { %1267 = vmatprep.subr.bf16.mxu1 %v1625_v1  ;;  %v1428_v21 = vld [vmem:[%s1991_s0] sm:$0xff]   ;;  %v1445_v25 = vld [vmem:[%s1992_s1 + $0x18] sm:$0xff]   ;;  %v1431_v26 = vld [vmem:[%s1991_s0 + $0x8] sm:$0xff]   ;;  %s1554_s18 = scalar_lea.vmem %s1553_s15, 512 }
  0x5f   : > { %v1433_v27 = vld [vmem:[%s1995_s4 + $0x18] sm:$0xff]   ;;  %v1446_v28 = vld [vmem:[%s1992_s1 + $0x20] sm:$0xff]   ;;  %v1447_v30 = vld [vmem:[%s1992_s1 + $0x28] sm:$0xff]  }
  0x60   : > { %426 = vmatpush1.bf16.msra.mxu0 %v1412_v7  ;;  %v1435_v29 = vld [vmem:[%s1995_s4 + $0x20] sm:$0xff]   ;;  %v1434_v31 = vld [vmem:[%s1991_s0 + $0x10] sm:$0xff]   ;;  %v1436_v32 = vld [vmem:[%s1995_s4 + $0x28] sm:$0xff]  }
  0x61   : > { %427 = vmatprep.subr.bf16.mxu0 %v1413_v8  ;;  %1268 = vmatpush3.bf16.msra.mxu1 %v1443_v19  ;;  %v1448_v33 = vld [vmem:[%s1992_s1 + $0x30] sm:$0xff]   ;;  %v1449_v35 = vld [vmem:[%s1992_s1 + $0x38] sm:$0xff]   ;;  %v1440_v37 = vld [vmem:[%s1824_s20] sm:$0xff]  }
  0x62   : > { %1269 = vmatprep.subr.bf16.mxu1 %v1625_v1  ;;  %v1438_v34 = vld [vmem:[%s1995_s4 + $0x30] sm:$0xff]   ;;  %v1437_v36 = vld [vmem:[%s1991_s0 + $0x18] sm:$0xff]   ;;  %v494_v39 = vld [vmem:[%s1996_s5] sm:$0xf] }
  0x63   : > { %v1439_v38 = vld [vmem:[%s1995_s4 + $0x38] sm:$0xff]   ;;  %v1441_v40 = vld [vmem:[%s1824_s20 + $0x8] sm:$0xff]   ;;  %s1222_s20 = sshll.u32 %s1688_s25, 8  ;;  %s1057_s25 = scalar_lea.sflag [#allocation4], %s1803_s26 }
  0x64   : > { %428 = vmatpush1.bf16.msra.mxu0 %v1415_v9  ;;  %s1945_s10 = scalar_lea.hbm %s1997_s6, %s1222_s20 }
  0x65   : > { %429 = vmatprep.subr.bf16.mxu0 %v1416_v10  ;;  %1270 = vmatpush3.bf16.msra.mxu1 %v1444_v23 }
  0x66   : > { %1271 = vmatprep.subr.bf16.mxu1 %v1625_v1 }
  0x68   : > { %430 = vmatpush1.bf16.msra.mxu0 %v1418_v11  ;;  %v761_v11 = vlaneseq }
  0x69   : > { %431 = vmatprep.subr.bf16.mxu0 %v1419_v12  ;;  %1272 = vmatpush3.bf16.msra.mxu1 %v1445_v25 }
  0x6a   : > { %1273 = vmatprep.subr.bf16.mxu1 %v1625_v1  ;;  %v762_v12 = vshrl.u32 %v761_v11, 7 }
  0x6c   : > { %432 = vmatpush1.bf16.msra.mxu0 %v1421_v13  ;;  %v724_v13 = vld [vmem:[%s1807_s17] sm:$0xff]  ;;  %s1164_s17 = sshll.u32 %s1803_s26, 4 }
  0x6d   : > { %433 = vmatprep.subr.bf16.mxu0 %v1422_v14  ;;  %1274 = vmatpush3.bf16.msra.mxu1 %v1446_v28  ;;  %v850_v14 = vsub.s32 1, %v762_v12  ;;  %v726_v19 = vunpack.c.1.s8 %v724_v13  ;;  %s281_s16 = scalar_lea.vmem [#allocation7], %s1164_s17 }
  0x6e   : > { %1275 = vmatprep.subr.bf16.mxu1 %v1625_v1  ;;  %s1070_s27 = sshll.u32 %s281_s16, 4  ;;  %s1947_s27 = int_to_ptr.vmem [resolvable:$true] %s1070_s27 }
  0x6f   : > { %s1548_s11 = scalar_lea.vmem %s1947_s27, 256  ;;  %p1555_p10 = scmp.lt.s32.totalorder %s1947_s27, %s1553_s15 }
  0x70   : > { %434 = vmatpush1.bf16.msra.mxu0 %v1424_v15  ;;  %v725_v15 = vunpack.c.0.s8 %v724_v13  ;;  %p1549_p4 = scmp.ne.s32.totalorder %s1947_s27, %s1548_s11  ;;  %p1556_p13 = scmp.lt.s32.totalorder %s1554_s18, %s1548_s11 }
  0x71   : > { %435 = vmatprep.subr.bf16.mxu0 %v1425_v16  ;;  %1276 = vmatpush3.bf16.msra.mxu1 %v1447_v30  ;;  %v728_v16 = vunpack.c.3.s8 %v724_v13 }
  0x72   : > { %1277 = vmatprep.subr.bf16.mxu1 %v1625_v1  ;;  %p1550_p6 = pnand %p1549_p4, %p1758_p12  ;;  %p1557_p3 = por %p1556_p13, %p1555_p10 }
  0x73   : > { %v732_v23 = vcvt.s32.f32 %v728_v16 }
  0x74   : > { %436 = vmatpush1.bf16.msra.mxu0 %v1427_v18  ;;  %v729_v18 = vcvt.s32.f32 %v725_v15  ;;  %p1551_p8 = pneg %p1550_p6 }
  0x75   : > { %1285 = vmatprep.subr.bf16.mxu0 %v1429_v20  ;;  %1278 = vmatpush3.bf16.msra.mxu1 %v1448_v33  ;;  %vm736_vm2 = vcmp.gt.f32.partialorder %v732_v23, 0.0 }
  0x76   : > { %1279 = vmatprep.subr.bf16.mxu1 %v1625_v1  ;;  %vm733_vm1 = vcmp.gt.f32.partialorder %v729_v18, 0.0  ;;  %p1558_p7 = pnand %p1557_p3, %p1551_p8 }
  0x77   : > { %454 = vmatmul.mubr.bf16.vlgmr.msra.gmra.mrb[0].mxu0 %v1428_v21  ;;  %v727_v21 = vunpack.c.2.s8 %v724_v13 }
  0x78   : > { %1286 = vmatpush3.bf16.msra.mxu0 %v1429_v20  ;;  %463 = vmatprep.mubr.bf16.mxu0 %v1624_v0 }
  0x79   : > { %1287 = vmatprep.subr.bf16.mxu0 %v1430_v22  ;;  %1280 = vmatpush3.bf16.msra.mxu1 %v1449_v35 }
  0x7c   : > { %1288 = vmatpush3.bf16.msra.mxu0 %v1430_v22  ;;  %1282 = vmatmul.mubr.bf16.vlgmr.msra.gmra.mrb[0].mxu1 %v494_v39 }
  0x7d   : > { %1289 = vmatprep.subr.bf16.mxu0 %v1432_v24 }
  0x7f   : > { %464 = vmatmul.mubr.bf16.gmra.mrb[4].mxu0 %v1431_v26  ;;  %v763_v26 = vsub.s32 0, %v762_v12 }
  0x80   : > { %1290 = vmatpush3.bf16.msra.mxu0 %v1432_v24  ;;  %473 = vmatprep.mubr.bf16.mxu0 %v1624_v0 }
  0x81   : > { %1291 = vmatprep.subr.bf16.mxu0 %v1433_v27 }
  0x84   : > { %1292 = vmatpush3.bf16.msra.mxu0 %v1433_v27 }
  0x85   : > { %1293 = vmatprep.subr.bf16.mxu0 %v1435_v29 }
  0x87   : > { %474 = vmatmul.mubr.bf16.gmra.mrb[8].mxu0 %v1434_v31 }
  0x88   : > { %1294 = vmatpush3.bf16.msra.mxu0 %v1435_v29  ;;  %483 = vmatprep.mubr.bf16.mxu0 %v1624_v0  ;;  %v731_v29 = vcvt.s32.f32 %v727_v21 }
  0x89   : > { %1295 = vmatprep.subr.bf16.mxu0 %v1436_v32 }
  0x8a   : > { %vm735_vm5 = vcmp.gt.f32.partialorder %v731_v29, 0.0 }
  0x8c   : > { %1296 = vmatpush3.bf16.msra.mxu0 %v1436_v32  ;;  %v1628_v32 = vmov -9e+15  }
  0x8d   : > { %1297 = vmatprep.subr.bf16.mxu0 %v1438_v34  ;;  %v737_v33 = vsel %vm733_vm1, 0.0, %v1628_v32 }
  0x8f   : > { %484 = vmatmul.mubr.bf16.gmra.mrb[12].mxu0 %v1437_v36 }
  0x90   : > { %1298 = vmatpush3.bf16.msra.mxu0 %v1438_v34  ;;  %1301 = vmatprep.mubr.bf16.mxu0 %v1440_v37 }
  0x91   : > { %1299 = vmatprep.subr.bf16.mxu0 %v1439_v38 }
  0x94   : > { %1300 = vmatpush3.bf16.msra.mxu0 %v1439_v38 }
  0x97   : > { %1302 = vmatmul.mubr.bf16.vlgmr.msra.gmra.mrb[16].mxu0 %v1441_v40 }
 0x14a   : > { %v455_v42 = vpop.f32.mrb[0].mxu0 }
 0x14b   : > { %v457_v43 = vpop.f32.mrb[1].mxu0 }
 0x14c   : > { %v459_v44 = vpop.f32.mrb[2].mxu0 }
 0x14d   : > { %v1901_v45 = vpack.c.bf16 %v459_v44, %v455_v42  ;;  %v461_v46 = vpop.f32.mrb[3].mxu0 }
 0x14e   : > { %v914_v47 = vpack.c.bf16 %v461_v46, %v457_v43 }
 0x14f   : > { %v593_v63 = vpop.f32.mrb[0].mxu1 }
 0x150   : > { %1305 = vmatprep.subr.bf16.mxu1 %v914_v47  ;;  %v1283_v3 = vpop.f32.mrb[1].mxu1  ;;  %v851_v17 = vrot.slane %v593_v63, %v850_v14  ;;  %v764_v37 = vrot.slane %v593_v63, %v763_v26 }
 0x151   : > { %1306 = vmatpush3.bf16.msra.mxu1 %v914_v47  ;;  %v596_v5 = vpop.f32.mrb[2].mxu1 }
 0x152   : > { %v465_v48 = vpop.f32.mrb[4].mxu0  ;;  %v1284_v6 = vpop.f32.mrb[3].mxu1 }
 0x153   : > { %v467_v49 = vpop.f32.mrb[5].mxu0 }
 0x154   : > { %v469_v50 = vpop.f32.mrb[6].mxu0 }
 0x155   : > { %v1903_v51 = vpack.c.bf16 %v469_v50, %v465_v48  ;;  %v471_v52 = vpop.f32.mrb[7].mxu0 }
 0x156   : > { %v915_v53 = vpack.c.bf16 %v471_v52, %v467_v49 }
 0x158   : > { %1307 = vmatprep.subr.bf16.mxu1 %v915_v53 }
 0x159   : > { %1308 = vmatpush3.bf16.msra.mxu1 %v915_v53 }
 0x15a   : > { %v475_v54 = vpop.f32.mrb[8].mxu0 }
 0x15b   : > { %v477_v55 = vpop.f32.mrb[9].mxu0 }
 0x15c   : > { %v479_v56 = vpop.f32.mrb[10].mxu0 }
 0x15d   : > { %v1905_v57 = vpack.c.bf16 %v479_v56, %v475_v54  ;;  %v481_v58 = vpop.f32.mrb[11].mxu0  ;;  %v739_v54 = vsel %vm735_vm5, 0.0, %v1628_v32 }
 0x15e   : > { %v916_v59 = vpack.c.bf16 %v481_v58, %v477_v55 }
 0x160   : > { %1309 = vmatprep.subr.bf16.mxu1 %v916_v59 }
 0x161   : > { %1310 = vmatpush3.bf16.msra.mxu1 %v916_v59 }
 0x162   : > { %v485_v60 = vpop.f32.mrb[12].mxu0 }
 0x163   : > { %v487_v61 = vpop.f32.mrb[13].mxu0 }
 0x164   : > { %v489_v62 = vpop.f32.mrb[14].mxu0 }
 0x165   : > { %v1907_v1 = vpack.c.bf16 %v489_v62, %v485_v60  ;;  %v491_v2 = vpop.f32.mrb[15].mxu0 }
 0x166   : > { %v917_v4 = vpack.c.bf16 %v491_v2, %v487_v61 }
 0x168   : > { %1311 = vmatprep.subr.bf16.mxu1 %v917_v4 }
 0x169   : > { %1312 = vmatpush3.bf16.msra.mxu1 %v917_v4 }
 0x16a   : > { %v1303_v7 = vpop.f32.mrb[16].mxu0  ;;  %1317 = vmatprep.subr.bf16.mxu1 %v1901_v45 }
 0x16b   : > { %841 = vperm.xlu1 %1400, %v1303_v7   ;;  %v709_v8 = vpop.f32.mrb[17].mxu0 }
 0x16c   : > { %833 = vperm.xlu0 %1399, %v709_v8   ;;  %v1304_v9 = vpop.f32.mrb[18].mxu0 }
 0x16d   : > { %v712_v10 = vpop.f32.mrb[19].mxu0 }
 0x16f   : > { %845 = vperm.xlu1 %1400, %v1304_v9  }
 0x170   : > { %837 = vperm.xlu0 %1399, %v712_v10  }
 0x173   : > { %1402 = vset.pattern.permute.xlu1 %v1624_v0 }
 0x174   : > { %748 = vperm.xlu1 %1402, %v712_v10   ;;  %1401 = vset.pattern.permute.xlu0 %v1624_v0  ;;  %v730_v0 = vcvt.s32.f32 %v726_v19 }
 0x175   : > { %743 = vperm.xlu0 %1401, %v709_v8  }
 0x176   : > { %vm734_vm3 = vcmp.gt.f32.partialorder %v730_v0, 0.0 }
 0x177   : > { %v738_v44 = vsel %vm734_vm3, 0.0, %v1628_v32 }
 0x178   : > { %753 = vperm.xlu1 %1402, %v1303_v7  }
 0x179   : > { %758 = vperm.xlu0 %1401, %v1304_v9  }
 0x17d   : > { %1403 = vset.pattern.permute.xlu0 %v1627_v41  ;;  %v740_v41 = vsel %vm736_vm2, 0.0, %v1628_v32 }
 0x1ea   : > { %v842_v20 = vpop.permute.xlu1 %841 }
 0x1eb   : > { %v834_v22 = vpop.permute.xlu0 %833  ;;  %v854_v24 = vadd.f32 %v851_v17, %v842_v20 }
 0x1ec   : > { %v852_v25 = vadd.f32 %v851_v17, %v834_v22 }
 0x1ed   : > { %v858_v34 = vmul.f32 0.01, %v854_v24 }
 0x1ee   : > { %v856_v27 = vmul.f32 0.01, %v852_v25  ;;  %v846_v28 = vpop.permute.xlu1 %845 }
 0x1ef   : > { %v855_v30 = vadd.f32 %v851_v17, %v846_v28  ;;  %v838_v31 = vpop.permute.xlu0 %837  ;;  %v862_v46 = vmax.f32 %v854_v24, %v858_v34 }
 0x1f0   : > { %v860_v35 = vmax.f32 %v852_v25, %v856_v27  ;;  %v853_v36 = vadd.f32 %v851_v17, %v838_v31 }
 0x1f1   : > { %v859_v38 = vmul.f32 0.01, %v855_v30  ;;  %v866_v3 = vadd.f32 %v862_v46, %v739_v54 }
 0x1f2   : > { %v857_v39 = vmul.f32 0.01, %v853_v36  ;;  %v864_v40 = vadd.f32 %v860_v35, %v737_v33 }
 0x1f3   : > { %v863_v42 = vmax.f32 %v855_v30, %v859_v38  ;;  %v749_v43 = vpop.permute.xlu1 %748  ;;  %v874_v11 = vsel %vm781_vm4, %v866_v3, -inf }
 0x1f4   : > { %v861_v47 = vmax.f32 %v853_v36, %v857_v39  ;;  %v766_v48 = vadd.f32 %v764_v37, %v749_v43  ;;  %v744_v49 = vpop.permute.xlu0 %743  ;;  %v868_v50 = vsel %vm781_vm4, %v864_v40, -inf }
 0x1f5   : > { %v765_v52 = vadd.f32 %v764_v37, %v744_v49  ;;  %869 = vmax.xlane.f32.xlu1 %v868_v50  ;;  %v867_v53 = vadd.f32 %v863_v42, %v740_v41 }
 0x1f6   : > { %v770_v55 = vmul.f32 0.01, %v766_v48  ;;  %v865_v56 = vadd.f32 %v861_v47, %v738_v44 }
 0x1f7   : > { %v769_v58 = vmul.f32 0.01, %v765_v52  ;;  %v754_v59 = vpop.permute.xlu1 %753  ;;  %v877_v60 = vsel %vm781_vm4, %v867_v53, -inf }
 0x1f8   : > { %v774_v61 = vmax.f32 %v766_v48, %v770_v55  ;;  %v767_v62 = vadd.f32 %v764_v37, %v754_v59  ;;  %v759_v63 = vpop.permute.xlu0 %758  ;;  %v871_v2 = vsel %vm781_vm4, %v865_v56, -inf }
 0x1f9   : > { %v773_v4 = vmax.f32 %v765_v52, %v769_v58  ;;  %v768_v5 = vadd.f32 %v764_v37, %v759_v63  ;;  %878 = vmax.xlane.f32.xlu1 %v877_v60  ;;  %872 = vmax.xlane.f32.xlu0 %v871_v2 }
 0x1fa   : > { %v771_v6 = vmul.f32 0.01, %v767_v62  ;;  %v778_v7 = vadd.f32 %v774_v61, %v738_v44 }
 0x1fb   : > { %v772_v8 = vmul.f32 0.01, %v768_v5  ;;  %v777_v12 = vadd.f32 %v773_v4, %v737_v33 }
 0x1fc   : > { %v775_v9 = vmax.f32 %v767_v62, %v771_v6  ;;  %v785_v10 = vsel %vm781_vm4, %v778_v7, -inf }
 0x1fd   : > { %v776_v13 = vmax.f32 %v768_v5, %v772_v8  ;;  %786 = vmax.xlane.f32.xlu1 %v785_v10  ;;  %875 = vmax.xlane.f32.xlu0 %v874_v11  ;;  %v782_v15 = vsel %vm781_vm4, %v777_v12, -inf }
 0x1fe   : > { %v779_v16 = vadd.f32 %v775_v9, %v739_v54 }
 0x1ff   : > { %v780_v14 = vadd.f32 %v776_v13, %v740_v41 }
 0x200   : > { %v788_v18 = vsel %vm781_vm4, %v779_v16, -inf }
 0x201   : > { %783 = vmax.xlane.f32.xlu0 %v782_v15  ;;  %v791_v17 = vsel %vm781_vm4, %v780_v14, -inf }
 0x202   : > { %792 = vmax.xlane.f32.xlu1 %v791_v17 }
 0x205   : > { %789 = vmax.xlane.f32.xlu0 %v788_v18 }
 0x282   : > { %v870_v19 = vpop.xlane.xlu1 %869 }
 0x283   : > { %v880_v20 = vsub.f32 %v864_v40, %v870_v19 }
 0x285   : > { %v884_v21 = vmul.f32 1.442695, %v880_v20 }
 0x286   : > { %v879_v22 = vpop.xlane.xlu1 %878  ;;  %v873_v23 = vpop.xlane.xlu0 %872 }
 0x287   : > { %1450 = vpow2.f32 %v884_v21  ;;  %v883_v24 = vsub.f32 %v867_v53, %v879_v22  ;;  %v881_v25 = vsub.f32 %v865_v56, %v873_v23 }
 0x289   : > { %v886_v0 = vmul.f32 1.442695, %v881_v25  ;;  %v890_v26 = vmul.f32 1.442695, %v883_v24 }
 0x28a   : > { %v787_v27 = vpop.xlane.xlu1 %786  ;;  %v876_v28 = vpop.xlane.xlu0 %875 }
 0x28b   : > { %v795_v29 = vsub.f32 %v778_v7, %v787_v27  ;;  %v882_v30 = vsub.f32 %v866_v3, %v876_v28  ;;  %1452 = vpow2.f32 %v886_v0 }
 0x28c   : > { %1454 = vpow2.f32 %v890_v26 }
 0x28d   : > { %v888_v31 = vmul.f32 1.442695, %v882_v30  ;;  %v800_v32 = vmul.f32 1.442695, %v795_v29 }
 0x28e   : > { %v784_v33 = vpop.xlane.xlu0 %783 }
 0x28f   : > { %v794_v34 = vsub.f32 %v777_v12, %v784_v33  ;;  %v793_v35 = vpop.xlane.xlu1 %792  ;;  %1456 = vpow2.f32 %v888_v31 }
 0x290   : > { %v797_v36 = vsub.f32 %v780_v14, %v793_v35  ;;  %1458 = vpow2.f32 %v800_v32 }
 0x291   : > { %v1451_v37 = vpop.eup %1450  ;;  %v798_v38 = vmul.f32 1.442695, %v794_v34 }
 0x292   : > { %v804_v39 = vmul.f32 1.442695, %v797_v36  ;;  %v790_v40 = vpop.xlane.xlu0 %789  ;;  %v892_v41 = vsel %vm781_vm4, %v1451_v37, 0.0 }
 0x293   : > { %1460 = vpow2.f32 %v798_v38  ;;  %v796_v42 = vsub.f32 %v779_v16, %v790_v40  ;;  %893 = vadd.xlane.f32.xlu0 %v892_v41 }
 0x294   : > { %1462 = vpow2.f32 %v804_v39 }
 0x295   : > { %v802_v43 = vmul.f32 1.442695, %v796_v42  ;;  %v1453_v44 = vpop.eup %1452 }
 0x296   : > { %v895_v46 = vsel %vm781_vm4, %v1453_v44, 0.0  ;;  %v1455_v47 = vpop.eup %1454 }
 0x297   : > { %1464 = vpow2.f32 %v802_v43  ;;  %896 = vadd.xlane.f32.xlu1 %v895_v46  ;;  %v901_v49 = vsel %vm781_vm4, %v1455_v47, 0.0 }
 0x299   : > { %v1457_v48 = vpop.eup %1456 }
 0x29a   : > { %v898_v50 = vsel %vm781_vm4, %v1457_v48, 0.0  ;;  %v1459_v52 = vpop.eup %1458 }
 0x29b   : > { %902 = vadd.xlane.f32.xlu1 %v901_v49  ;;  %899 = vadd.xlane.f32.xlu0 %v898_v50  ;;  %v809_v55 = vsel %vm781_vm4, %v1459_v52, 0.0 }
 0x29d   : > { %v1461_v53 = vpop.eup %1460 }
 0x29e   : > { %v806_v54 = vsel %vm781_vm4, %v1461_v53, 0.0  ;;  %v1463_v56 = vpop.eup %1462 }
 0x29f   : > { %810 = vadd.xlane.f32.xlu1 %v809_v55  ;;  %807 = vadd.xlane.f32.xlu0 %v806_v54  ;;  %v815_v60 = vsel %vm781_vm4, %v1463_v56, 0.0 }
 0x2a1   : > { %v1465_v58 = vpop.eup %1464 }
 0x2a2   : > { %v812_v59 = vsel %vm781_vm4, %v1465_v58, 0.0 }
 0x2a3   : > { %816 = vadd.xlane.f32.xlu1 %v815_v60  ;;  %813 = vadd.xlane.f32.xlu0 %v812_v59 }
 0x320   : > { %v894_v61 = vpop.xlane.xlu0 %893 }
 0x321   : > { %1466 = vrcp.f32 %v894_v61 }
 0x324   : > { %v897_v62 = vpop.xlane.xlu1 %896 }
 0x325   : > { %1468 = vrcp.f32 %v897_v62 }
 0x328   : > { %v903_v63 = vpop.xlane.xlu1 %902  ;;  %v900_v2 = vpop.xlane.xlu0 %899 }
 0x329   : > { %1470 = vrcp.f32 %v903_v63 }
 0x32a   : > { %1472 = vrcp.f32 %v900_v2 }
 0x32b   : > { %v1467_v5 = vpop.eup %1466 }
 0x32c   : > { %v811_v3 = vpop.xlane.xlu1 %810  ;;  %v808_v4 = vpop.xlane.xlu0 %807  ;;  %v905_v7 = vmul.f32 %v1467_v5, %v1451_v37 }
 0x32d   : > { %1474 = vrcp.f32 %v811_v3 }
 0x32e   : > { %1476 = vrcp.f32 %v808_v4 }
 0x32f   : > { %v1469_v6 = vpop.eup %1468 }
 0x330   : > { %v907_v8 = vmul.f32 %v1469_v6, %v1453_v44  ;;  %v817_v9 = vpop.xlane.xlu1 %816  ;;  %v814_v12 = vpop.xlane.xlu0 %813 }
 0x331   : > { %1478 = vrcp.f32 %v817_v9 }
 0x332   : > { %v912_v10 = vpack.c.bf16 %v907_v8, %v905_v7  ;;  %1480 = vrcp.f32 %v814_v12 }
 0x333   : > { %v1471_v11 = vpop.eup %1470 }
 0x334   : > { %v1473_v13 = vpop.eup %1472  ;;  %v911_v14 = vmul.f32 %v1471_v11, %v1455_v47  ;;  %1313 = vmatprep.mubr.msk.bf16.mxu1 %vm781_vm4, %v912_v10 }
 0x335   : > { %v909_v15 = vmul.f32 %v1473_v13, %v1457_v48 }
 0x337   : > { %v1475_v16 = vpop.eup %1474  ;;  %v913_v17 = vpack.c.bf16 %v911_v14, %v909_v15 }
 0x338   : > { %v1477_v18 = vpop.eup %1476  ;;  %v821_v19 = vmul.f32 %v1475_v16, %v1459_v52 }
 0x339   : > { %1314 = vmatmul.mubr.msk.bf16.vlgmr.msra.gmra.mrb[4].mxu1 %vm781_vm4, %v913_v17  ;;  %v819_v20 = vmul.f32 %v1477_v18, %v1461_v53 }
 0x33a   : > { %1318 = vmatpush3.bf16.msra.mxu1 %v1901_v45 }
 0x33b   : > { %1319 = vmatprep.subr.bf16.mxu1 %v1903_v51  ;;  %v826_v21 = vpack.c.bf16 %v821_v19, %v819_v20  ;;  %v1479_v22 = vpop.eup %1478 }
 0x33c   : > { %v1481_v23 = vpop.eup %1480  ;;  %v825_v24 = vmul.f32 %v1479_v22, %v1463_v56 }
 0x33d   : > { %1325 = vmatprep.mubr.msk.bf16.mxu1 %vm781_vm4, %v826_v21  ;;  %v823_v25 = vmul.f32 %v1481_v23, %v1465_v58 }
 0x33e   : > { %1320 = vmatpush3.bf16.msra.mxu1 %v1903_v51 }
 0x33f   : > { %1321 = vmatprep.subr.bf16.mxu1 %v1905_v57  ;;  %v827_v45 = vpack.c.bf16 %v825_v24, %v823_v25 }
 0x342   : > { %1322 = vmatpush3.bf16.msra.mxu1 %v1905_v57 }
 0x343   : > { %1323 = vmatprep.subr.bf16.mxu1 %v1907_v1 }
 0x346   : > { %1324 = vmatpush3.bf16.msra.mxu1 %v1907_v1 }
 0x349   : > { %1326 = vmatmul.mubr.msk.bf16.vlgmr.msra.gmra.mrb[4].mxu1 %vm781_vm4, %v827_v45 }
 0x41c   : > { %v1327_v0 = vpop.f32.mrb[4].mxu1 }
 0x41d   : > { %v1030_v26 = vmul.f32 0.5, %v1327_v0  ;;  %v1013_v51 = vpop.f32.mrb[5].mxu1 }
 0x41e   : > { %v1028_v27 = vmul.f32 0.5, %v1013_v51  ;;  %v1328_v28 = vpop.f32.mrb[6].mxu1 }
 0x41f   : > { %1482 = vtanh.f32 %v1030_v26  ;;  %v1031_v29 = vmul.f32 0.5, %v1328_v28  ;;  %v1016_v30 = vpop.f32.mrb[7].mxu1 }
 0x420   : > { %1484 = vtanh.f32 %v1028_v27  ;;  %v1029_v57 = vmul.f32 0.5, %v1016_v30 }
 0x421   : > { %1486 = vtanh.f32 %v1031_v29 }
 0x422   : > { %1488 = vtanh.f32 %v1029_v57 }
 0x429   : > { %v1483_v31 = vpop.eup %1482 }
 0x42a   : > { %v1485_v1 = vpop.eup %1484 }
 0x42b   : > { %v1487_v32 = vpop.eup %1486 }
 0x42c   : > { %v1489_v33 = vpop.eup %1488  ;;  %v1231_v34 = vpack.c.bf16 %v1487_v32, %v1483_v31 }
 0x42d   : > { %v1226_v35 = vpack.c.bf16 %v1489_v33, %v1485_v1 }
 0x42e   : > { %1233 = vst [vmem:[%s281_s16 + $0x8] sm:$0xff] %v1231_v34  }
 0x42f   : > { %1227 = vst [vmem:[%s281_s16] sm:$0xff] %v1226_v35  }
 0x430   : > { %1561 = shalt.err (!%p1558_p7)
}
 0x431   : > { %s1562_s7 = scalar_lea.hbm %s1945_s10, 256  ;;  %s1566_s17 = scalar_lea.hbm %s1997_s6, 512 }
 0x432   : > { %p1563_p9 = scmp.ne.s32.totalorder %s1945_s10, %s1562_s7  ;;  %p1567_p0 = scmp.lt.u32.totalorder %s1945_s10, %s1997_s6 }
 0x433   : > { %p1568_p11 = scmp.lt.u32.totalorder %s1566_s17, %s1562_s7  ;;  %p1570_p4 = scmp.lt.u32.totalorder %s1562_s7, %s1945_s10 }
 0x434   : > { %p1564_p2 = pnand %p1563_p9, %p1758_p12 }
 0x435   : > { %p1569_p1 = por %p1568_p11, %p1567_p0 }
 0x436   : > { %p1565_p5 = pneg %p1564_p2 }
 0x437   : > { %p1571_p6 = por %p1570_p4, %p1569_p1 }
 0x439   : > { %p1572_p8 = pnand %p1571_p6, %p1565_p5 }
 0x43b   : > { %1575 = shalt.err (!%p1572_p8)
}
 0x43c   : > { %s1630_s29 = smov 64   ;;  %s1631_s19 = smov 4  }
 0x43d   : > { %1339 = dma.vmem_to_hbm [thread:$0]  (%p1758_p12), %s1947_s27, 256, %s1945_s10, %s1057_s25, %s1630_s29, %s1630_s29, %s1631_s19  }
 0x43e PF: > { %s1085_s11 = sand.u32 1, %s1606_s21   ;;  %p2012_p10 = scmp.ne.s32.totalorder %s2002_s28, 0 }
 0x43f   : > { %p2013_p13 = scmp.ge.s32.totalorder %s1618_s24, 2  ;;  %s1086_s8 = scalar_lea.sflag [#allocation4], %s1085_s11 }
 0x441   : > { %p1350_p3 = pnand %p2013_p13, %p2012_p10 }
 0x443   : > { %1601 = dma.done.wait (!%p1350_p3), %s1086_s8, 256  }
 0x444   : > { %1603 = vsyncadd (!%p1350_p3), %s1086_s8, 4294967040  ;;  %p20_p7 = scmp.ge.s32.totalorder %s1723_s9, 4   ;;  %s2014_s21 = smov %s1610_s22 }
 0x445   : > { %s2015_s22 = smov %s1614_s23  ;;  %s2016_s23 = smov %s1754_s13 }
 0x446   : > { %s2017_s24 = smov %s1723_s9  ;;  %22 = sbr.rel (!%p20_p7) target bundleno = 6 (0x6), region = 94 }
 0x44d   :  { %1091 = vsyncpa [#allocation3], 1 }
 0x44e   :  { %1093 = vsyncpa [#allocation3 + $0x1], 1 }
 0x44f   :  { %1094 = vsyncpa [#allocation6], 1 }
 0x450   :  { %1095 = vsyncpa [#allocation4], 1 }
 0x451   :  { %1097 = vsyncpa [#allocation4 + $0x1], 1 }

</bundles_post_ra>
